<compile_context>
chip_gen: v5e
topology: v5e:2x2
jax: 0.10.0
libtpu: 0.0.40
codegen_flags: <defaults>
</compile_context>

<pallas_src>
import jax
import jax.numpy as jnp
from jax.experimental import pallas as pl
from jax.experimental.pallas import tpu as pltpu

LANE = 128                 # vreg lane width: pad all feature dims to this
DEFAULT_TILE_B = 512       # batch rows per grid step (fits v7x VMEM easily)


def _round_up(n, m):
    return ((n + m - 1) // m) * m


def _pad2(a, rows, cols):
    return jnp.pad(a, ((0, rows - a.shape[0]), (0, cols - a.shape[1])))


def _mlp_kernel(x_ref, w1_ref, b1_ref, w2_ref, b2_ref, w3_ref, b3_ref, out_ref):
    # fc1 + ReLU   (bf16 operands, f32 accumulation / elementwise)
    h1 = jnp.dot(x_ref[...], w1_ref[...], preferred_element_type=jnp.float32)
    h1 = jnp.maximum(h1 + b1_ref[...], 0.0)
    # fc2 + ReLU
    h2 = jnp.dot(h1.astype(jnp.bfloat16), w2_ref[...],
                 preferred_element_type=jnp.float32)
    h2 = jnp.maximum(h2 + b2_ref[...], 0.0)
    # fc3 + sigmoid
    logits = jnp.dot(h2.astype(jnp.bfloat16), w3_ref[...],
                     preferred_element_type=jnp.float32)
    logits = logits + b3_ref[...]
    out_ref[...] = jax.nn.sigmoid(logits).astype(out_ref.dtype)


def matchmaking_forward(x, params, tile_b=DEFAULT_TILE_B):
    """Fused 3-layer MLP forward pass.

    x: (B, input_size) float32
    params: dict with w1 (in,hid), b1 (1,hid), w2 (hid,hid), b2 (1,hid),
            w3 (hid,out), b3 (1,out)  -- all float32
    returns: (B, output_size) float32 in (0, 1)
    """
    w1, b1 = params["w1"], params["b1"]
    w2, b2 = params["w2"], params["b2"]
    w3, b3 = params["w3"], params["b3"]

    B, in_size = x.shape
    hid_size = w1.shape[1]
    out_size = w3.shape[1]

    # Lane-dense padded feature dims.
    in_p = _round_up(in_size, LANE)
    hid_p = _round_up(hid_size, LANE)
    out_p = _round_up(out_size, LANE)

    # Batch tile: multiple of 128 (bf16-friendly sublane tiling, full MXU rows).
    tile_b = min(tile_b, _round_up(B, LANE))
    b_pad = _round_up(B, tile_b)
    grid = (b_pad // tile_b,)

    # Zero-pad once in the wrapper; padded weight columns / bias entries are 0,
    # so ReLU keeps the padded hidden lanes exactly 0 and real outputs are
    # unchanged. bf16 for MXU operands, biases stay f32.
    x_p = _pad2(x, b_pad, in_p).astype(jnp.bfloat16)
    w1_p = _pad2(w1, in_p, hid_p).astype(jnp.bfloat16)
    w2_p = _pad2(w2, hid_p, hid_p).astype(jnp.bfloat16)
    w3_p = _pad2(w3, hid_p, out_p).astype(jnp.bfloat16)
    b1_p = _pad2(b1, 1, hid_p).astype(jnp.float32)
    b2_p = _pad2(b2, 1, hid_p).astype(jnp.float32)
    b3_p = _pad2(b3, 1, out_p).astype(jnp.float32)

    # Streamed tiles (x / out) move with the batch grid index; weights and
    # biases use constant index_maps -> VMEM-resident, DMA'd once.
    x_spec = pl.BlockSpec((tile_b, in_p), lambda i: (i, 0))
    out_spec = pl.BlockSpec((tile_b, out_p), lambda i: (i, 0))
    const = lambda a: pl.BlockSpec(a.shape, lambda i: (0, 0))

    out_padded = pl.pallas_call(
        _mlp_kernel,
        out_shape=jax.ShapeDtypeStruct((b_pad, out_p), jnp.float32),
        grid_spec=pltpu.PrefetchScalarGridSpec(
            num_scalar_prefetch=0,
            grid=grid,
            in_specs=[x_spec, const(w1_p), const(b1_p), const(w2_p),
                      const(b2_p), const(w3_p), const(b3_p)],
            out_specs=out_spec,
        ),
        compiler_params=pltpu.CompilerParams(
            dimension_semantics=("parallel",),
            vmem_limit_bytes=32 * 1024 * 1024,
        ),
    )(x_p, w1_p, b1_p, w2_p, b2_p, w3_p, b3_p)

    return out_padded[:B, :out_size]


def init_params(key, input_size, hidden_size, output_size):
    """Deterministic PyTorch-style (Kaiming-uniform-ish) init."""
    ks = jax.random.split(key, 6)

    def linear(kw, kb, fan_in, fan_out):
        bound = 1.0 / jnp.sqrt(fan_in)
        w = jax.random.uniform(kw, (fan_in, fan_out), jnp.float32, -bound, bound)
        b = jax.random.uniform(kb, (1, fan_out), jnp.float32, -bound, bound)
        return w, b

    w1, b1 = linear(ks[0], ks[1], input_size, hidden_size)
    w2, b2 = linear(ks[2], ks[3], hidden_size, hidden_size)
    w3, b3 = linear(ks[4], ks[5], hidden_size, output_size)
    return {"w1": w1, "b1": b1, "w2": w2, "b2": b2, "w3": w3, "b3": b3}


def _reference_forward_bf16(x, p):
    """Pure-JAX reference mirroring the kernel's bf16-operand / f32-accum math."""
    bf = jnp.bfloat16
    h1 = jax.nn.relu(
        jnp.dot(x.astype(bf), p["w1"].astype(bf),
                preferred_element_type=jnp.float32) + p["b1"])
    h2 = jax.nn.relu(
        jnp.dot(h1.astype(bf), p["w2"].astype(bf),
                preferred_element_type=jnp.float32) + p["b2"])
    logits = jnp.dot(h2.astype(bf), p["w3"].astype(bf),
                     preferred_element_type=jnp.float32) + p["b3"]
    return jax.nn.sigmoid(logits)


def _reference_forward_f32(x, p):
    h1 = jax.nn.relu(x @ p["w1"] + p["b1"])
    h2 = jax.nn.relu(h1 @ p["w2"] + p["b2"])
    return jax.nn.sigmoid(h2 @ p["w3"] + p["b3"])


if __name__ == "__main__":
    batch = 8
    input_size = 16
    hidden_size = 32
    output_size = 8

    key = jax.random.PRNGKey(0)
    k_x, k_p = jax.random.split(key)
    x = jax.random.normal(k_x, (batch, input_size), jnp.float32)
    params = init_params(k_p, input_size, hidden_size, output_size)

    out = matchmaking_forward(x, params)
    out = jax.block_until_ready(out)

    assert out.shape == (batch, output_size)

    # Exact-ish check vs. reference using the same bf16 operand quantization.
    ref_bf16 = _reference_forward_bf16(x, params)
    assert jnp.allclose(out, ref_bf16, atol=1e-4, rtol=1e-4), \
        f"max err vs bf16 ref: {jnp.max(jnp.abs(out - ref_bf16))}"

    # Sanity check vs. full-f32 math (bf16 quantization tolerance).
    ref_f32 = _reference_forward_f32(x, params)
    assert jnp.allclose(out, ref_f32, atol=2e-2), \
        f"max err vs f32 ref: {jnp.max(jnp.abs(out - ref_f32))}"

    # TODO(synk): training path (BCELoss + Adam in train_model) is not part of
    # the forward pass and is not translated to Pallas.

    print("KERNEL_OK")
</pallas_src>

<mosaic_0001>
module attributes {stable_mosaic.version = 11 : i64} {
  func.func @_mlp_kernel(%arg0: i32, %arg1: memref<128x128xbf16, #tpu.memory_space<vmem>>, %arg2: memref<128x128xbf16, #tpu.memory_space<vmem>>, %arg3: memref<1x128xf32, #tpu.memory_space<vmem>>, %arg4: memref<128x128xbf16, #tpu.memory_space<vmem>>, %arg5: memref<1x128xf32, #tpu.memory_space<vmem>>, %arg6: memref<128x128xbf16, #tpu.memory_space<vmem>>, %arg7: memref<1x128xf32, #tpu.memory_space<vmem>>, %arg8: memref<128x128xf32, #tpu.memory_space<vmem>>) attributes {dimension_semantics = [#tpu.dimension_semantics<parallel>], iteration_bounds = array<i64: 1>, scalar_prefetch = 0 : i64, scratch_operands = 0 : i64, tpu.core_type = #tpu.core_type<tc>, window_params = [{transform_indices = @transform_0, window_bounds = array<i64: 128, 128>}, {pipeline_mode = #tpu.pipeline_mode<synchronous>, transform_indices = @transform_1, window_bounds = array<i64: 128, 128>}, {pipeline_mode = #tpu.pipeline_mode<synchronous>, transform_indices = @transform_2, window_bounds = array<i64: 1, 128>}, {pipeline_mode = #tpu.pipeline_mode<synchronous>, transform_indices = @transform_3, window_bounds = array<i64: 128, 128>}, {pipeline_mode = #tpu.pipeline_mode<synchronous>, transform_indices = @transform_4, window_bounds = array<i64: 1, 128>}, {pipeline_mode = #tpu.pipeline_mode<synchronous>, transform_indices = @transform_5, window_bounds = array<i64: 128, 128>}, {pipeline_mode = #tpu.pipeline_mode<synchronous>, transform_indices = @transform_6, window_bounds = array<i64: 1, 128>}, {transform_indices = @transform_7, window_bounds = array<i64: 128, 128>}]} {
    %c0 = arith.constant 0 : index
    %c0_0 = arith.constant 0 : index
    %0 = vector.load %arg1[%c0, %c0_0] : memref<128x128xbf16, #tpu.memory_space<vmem>>, vector<128x128xbf16>
    %c0_1 = arith.constant 0 : index
    %c0_2 = arith.constant 0 : index
    %1 = vector.load %arg2[%c0_1, %c0_2] : memref<128x128xbf16, #tpu.memory_space<vmem>>, vector<128x128xbf16>
    %cst = arith.constant dense<0.000000e+00> : vector<128x128xf32>
    %2 = tpu.matmul %0, %1, %cst {dimension_numbers = #tpu.dot_dimension_numbers<[1], [0], [0], [1], [0, 0, 1, 1], [], []>} : vector<128x128xbf16>, vector<128x128xbf16>, vector<128x128xf32> -> vector<128x128xf32>
    %c0_3 = arith.constant 0 : index
    %c0_4 = arith.constant 0 : index
    %3 = vector.load %arg3[%c0_3, %c0_4] : memref<1x128xf32, #tpu.memory_space<vmem>>, vector<1x128xf32>
    %4 = vector.broadcast %3 : vector<1x128xf32> to vector<128x128xf32>
    %5 = arith.addf %2, %4 : vector<128x128xf32>
    %cst_5 = arith.constant 0.000000e+00 : f32
    %6 = vector.broadcast %cst_5 : f32 to vector<128x128xf32>
    %7 = arith.maximumf %5, %6 : vector<128x128xf32>
    %8 = arith.truncf %7 : vector<128x128xf32> to vector<128x128xbf16>
    %c0_6 = arith.constant 0 : index
    %c0_7 = arith.constant 0 : index
    %9 = vector.load %arg4[%c0_6, %c0_7] : memref<128x128xbf16, #tpu.memory_space<vmem>>, vector<128x128xbf16>
    %cst_8 = arith.constant dense<0.000000e+00> : vector<128x128xf32>
    %10 = tpu.matmul %8, %9, %cst_8 {dimension_numbers = #tpu.dot_dimension_numbers<[1], [0], [0], [1], [0, 0, 1, 1], [], []>} : vector<128x128xbf16>, vector<128x128xbf16>, vector<128x128xf32> -> vector<128x128xf32>
    %c0_9 = arith.constant 0 : index
    %c0_10 = arith.constant 0 : index
    %11 = vector.load %arg5[%c0_9, %c0_10] : memref<1x128xf32, #tpu.memory_space<vmem>>, vector<1x128xf32>
    %12 = vector.broadcast %11 : vector<1x128xf32> to vector<128x128xf32>
    %13 = arith.addf %10, %12 : vector<128x128xf32>
    %cst_11 = arith.constant 0.000000e+00 : f32
    %14 = vector.broadcast %cst_11 : f32 to vector<128x128xf32>
    %15 = arith.maximumf %13, %14 : vector<128x128xf32>
    %16 = arith.truncf %15 : vector<128x128xf32> to vector<128x128xbf16>
    %c0_12 = arith.constant 0 : index
    %c0_13 = arith.constant 0 : index
    %17 = vector.load %arg6[%c0_12, %c0_13] : memref<128x128xbf16, #tpu.memory_space<vmem>>, vector<128x128xbf16>
    %cst_14 = arith.constant dense<0.000000e+00> : vector<128x128xf32>
    %18 = tpu.matmul %16, %17, %cst_14 {dimension_numbers = #tpu.dot_dimension_numbers<[1], [0], [0], [1], [0, 0, 1, 1], [], []>} : vector<128x128xbf16>, vector<128x128xbf16>, vector<128x128xf32> -> vector<128x128xf32>
    %c0_15 = arith.constant 0 : index
    %c0_16 = arith.constant 0 : index
    %19 = vector.load %arg7[%c0_15, %c0_16] : memref<1x128xf32, #tpu.memory_space<vmem>>, vector<1x128xf32>
    %20 = vector.broadcast %19 : vector<1x128xf32> to vector<128x128xf32>
    %21 = arith.addf %18, %20 : vector<128x128xf32>
    %22 = arith.negf %21 : vector<128x128xf32>
    %23 = math.exp %22 : vector<128x128xf32>
    %cst_17 = arith.constant 1.000000e+00 : f32
    %24 = vector.broadcast %cst_17 : f32 to vector<128x128xf32>
    %25 = arith.addf %24, %23 : vector<128x128xf32>
    %26 = arith.divf %24, %25 : vector<128x128xf32>
    %c0_18 = arith.constant 0 : index
    %c0_19 = arith.constant 0 : index
    %27 = vector.load %arg8[%c0_18, %c0_19] : memref<128x128xf32, #tpu.memory_space<vmem>>, vector<128x128xf32>
    tpu.vector_store %arg8[%c0_18, %c0_19], %26 {strides = array<i32>} : memref<128x128xf32, #tpu.memory_space<vmem>>, vector<128x128xf32>,
    return
  }
  func.func @transform_0(%arg0: i32) -> (i32, i32) {
    %c0_i32 = arith.constant 0 : i32
    %c0_i32_0 = arith.constant 0 : i32
    return %arg0, %c0_i32 : i32, i32
  }
  func.func @transform_1(%arg0: i32) -> (i32, i32) {
    %c0_i32 = arith.constant 0 : i32
    %c0_i32_0 = arith.constant 0 : i32
    %c0_i32_1 = arith.constant 0 : i32
    return %c0_i32, %c0_i32_0 : i32, i32
  }
  func.func @transform_2(%arg0: i32) -> (i32, i32) {
    %c0_i32 = arith.constant 0 : i32
    %c0_i32_0 = arith.constant 0 : i32
    %c0_i32_1 = arith.constant 0 : i32
    return %c0_i32, %c0_i32_0 : i32, i32
  }
  func.func @transform_3(%arg0: i32) -> (i32, i32) {
    %c0_i32 = arith.constant 0 : i32
    %c0_i32_0 = arith.constant 0 : i32
    %c0_i32_1 = arith.constant 0 : i32
    return %c0_i32, %c0_i32_0 : i32, i32
  }
  func.func @transform_4(%arg0: i32) -> (i32, i32) {
    %c0_i32 = arith.constant 0 : i32
    %c0_i32_0 = arith.constant 0 : i32
    %c0_i32_1 = arith.constant 0 : i32
    return %c0_i32, %c0_i32_0 : i32, i32
  }
  func.func @transform_5(%arg0: i32) -> (i32, i32) {
    %c0_i32 = arith.constant 0 : i32
    %c0_i32_0 = arith.constant 0 : i32
    %c0_i32_1 = arith.constant 0 : i32
    return %c0_i32, %c0_i32_0 : i32, i32
  }
  func.func @transform_6(%arg0: i32) -> (i32, i32) {
    %c0_i32 = arith.constant 0 : i32
    %c0_i32_0 = arith.constant 0 : i32
    %c0_i32_1 = arith.constant 0 : i32
    return %c0_i32, %c0_i32_0 : i32, i32
  }
  func.func @transform_7(%arg0: i32) -> (i32, i32) {
    %c0_i32 = arith.constant 0 : i32
    %c0_i32_0 = arith.constant 0 : i32
    return %arg0, %c0_i32 : i32, i32
  }
}

</mosaic_0001>

<bundles_post_ra>
// kernel: tpu_custom_call.1
= control target key start
LH: loop header
LB: loop body
LE: loop exit
PB: predicated region body
PF: predicated region fallthrough
CT: control target
= control target key end

     0   :  { %12 = vsyncpa [#allocation3], 0  ;;  %s1510_s0 = inlined_call_operand.hbm [shape: bf16[128,128], index: 0, kind: input, shape index: {}]   ;;  %s1511_s1 = inlined_call_operand.hbm [shape: bf16[128,128], index: 1, kind: input, shape index: {}]   ;;  %s1512_s2 = inlined_call_operand.vmem [shape: f32[1,128], index: 2, kind: input, shape index: {}]   ;;  %s1513_s3 = inlined_call_operand.hbm [shape: bf16[128,128], index: 3, kind: input, shape index: {}]   ;;  %s1514_s4 = inlined_call_operand.vmem [shape: f32[1,128], index: 4, kind: input, shape index: {}]   ;;  %s1515_s5 = inlined_call_operand.hbm [shape: bf16[128,128], index: 5, kind: input, shape index: {}]   ;;  %s1516_s6 = inlined_call_operand.vmem [shape: f32[1,128], index: 6, kind: input, shape index: {}]   ;;  %s1517_s7 = inlined_call_operand.hbm [shape: f32[128,128], index: 7, kind: output, shape index: {}]  }
   0x1   :  { %13 = vsyncpa [#allocation6], 0 }
   0x2   :  { %14 = vsyncpa [#allocation9], 0 }
   0x3   :  { %15 = vsyncpa [#allocation4], 0  ;;  %s33_s26 = sshll.u32 %s1511_s1, 4  ;;  %s1298_s27 = smov [#allocation5]   ;;  %s34_s26 = int_to_ptr.hbm [resolvable:$true] %s33_s26 }
   0x4   :  { %s35_s28 = sshll.u32 %s1298_s27, 4  ;;  %s20_s8 = sshll.u32 %s1510_s0, 4  ;;  %s36_s28 = int_to_ptr.vmem [resolvable:$true] %s35_s28  ;;  %s21_s8 = int_to_ptr.hbm [resolvable:$true] %s20_s8 }
   0x5   :  { %s1299_s9 = smov 64   ;;  %s1300_s10 = smov 4  }
   0x6   :  { %41 = dma.hbm_to_vmem [thread:$0]  %s34_s26, 1024, %s36_s28, [#allocation6], %s1299_s9, %s1299_s9, %s1300_s10  }
   0x7   :  { %s1301_s11 = smov [#allocation2]   ;;  %s48_s15 = sshll.u32 %s1513_s3, 4  ;;  %s49_s15 = int_to_ptr.hbm [resolvable:$true] %s48_s15 }
   0x8   :  { %s22_s12 = sshll.u32 %s1301_s11, 4  ;;  %s63_s17 = sshll.u32 %s1515_s5, 4  ;;  %s23_s12 = int_to_ptr.vmem [resolvable:$true] %s22_s12  ;;  %s64_s17 = int_to_ptr.hbm [resolvable:$true] %s63_s17 }
   0x9   :  { %28 = dma.hbm_to_vmem [thread:$0]  %s21_s8, 1024, %s23_s12, [#allocation3], %s1299_s9, %s1299_s9, %s1300_s10  }
   0xa   :  { %s1302_s18 = smov [#allocation7]   ;;  %s1303_s0 = smov [#allocation8]  }
   0xb   :  { %s50_s19 = sshll.u32 %s1302_s18, 4  ;;  %s65_s20 = sshll.u32 %s1303_s0, 4  ;;  %s51_s19 = int_to_ptr.vmem [resolvable:$true] %s50_s19  ;;  %s66_s20 = int_to_ptr.vmem [resolvable:$true] %s65_s20 }
   0xc   :  { %56 = dma.hbm_to_vmem [thread:$0]  %s49_s15, 1024, %s51_s19, [#allocation6], %s1299_s9, %s1299_s9, %s1300_s10  }
   0xd   :  { %71 = dma.hbm_to_vmem [thread:$0]  %s64_s17, 1024, %s66_s20, [#allocation9], %s1299_s9, %s1299_s9, %s1300_s10  }
   0xe   :  { %1290 = dma.done.wait [#allocation3], 1024  }
   0xf   :  { %1291 = vsyncadd [#allocation3], 4294966272 }
  0x10   :  { %1292 = dma.done.wait [#allocation6], 2048  }
  0x11   :  { %1293 = vsyncadd [#allocation6], 4294965248 }
  0x12   :  { %1294 = dma.done.wait [#allocation9], 1024  }
  0x13   :  { %1295 = vsyncadd [#allocation9], 4294966272  ;;  %v1053_v0 = vld [vmem:[#allocation5 + $0x38] sm:$0xff]  ;;  %v1052_v1 = vld [vmem:[#allocation5 + $0x30] sm:$0xff]  ;;  %s879_s26 = sshll.u32 %s1517_s7, 4  ;;  %s1305_s27 = smov 128   ;;  %s880_s26 = int_to_ptr.hbm [resolvable:$true] %s879_s26 }
  0x14   :  { %222 = vmatpush.bf16.msra.mxu0 %v1053_v0  ;;  %1070 = vmatpush.bf16.msra.mxu3 %v1053_v0  ;;  %v1051_v2 = vld [vmem:[#allocation5 + $0x28] sm:$0xff]  ;;  %v1050_v3 = vld [vmem:[#allocation5 + $0x20] sm:$0xff]  ;;  %v1049_v4 = vld [vmem:[#allocation5 + $0x18] sm:$0xff]  ;;  %s1306_s28 = smov 8  }
  0x15   :  { %v1048_v5 = vld [vmem:[#allocation5 + $0x10] sm:$0xff]  ;;  %v1047_v6 = vld [vmem:[#allocation5 + $0x8] sm:$0xff]  ;;  %v1046_v7 = vld [vmem:[#allocation5] sm:$0xff] }
  0x16   :  { %v1038_v8 = vld [vmem:[#allocation2] sm:$0xff]  ;;  %v1044_v9 = vld [vmem:[#allocation2 + $0x30] sm:$0xff]  ;;  %v1039_v10 = vld [vmem:[#allocation2 + $0x8] sm:$0xff] }
  0x17   :  { %v1045_v11 = vld [vmem:[#allocation2 + $0x38] sm:$0xff]  ;;  %v1040_v12 = vld [vmem:[#allocation2 + $0x10] sm:$0xff]  ;;  %v1059_v16 = vld [vmem:[#allocation7 + $0x28] sm:$0xff] }
  0x18   :  { %223 = vmatpush.bf16.msra.mxu0 %v1052_v1  ;;  %1071 = vmatpush.bf16.msra.mxu3 %v1052_v1  ;;  %v1041_v13 = vld [vmem:[#allocation2 + $0x18] sm:$0xff]  ;;  %v1060_v15 = vld [vmem:[#allocation7 + $0x30] sm:$0xff]  ;;  %v1058_v17 = vld [vmem:[#allocation7 + $0x20] sm:$0xff] }
  0x19   :  { %v1061_v14 = vld [vmem:[#allocation7 + $0x38] sm:$0xff]  ;;  %v1042_v18 = vld [vmem:[#allocation2 + $0x20] sm:$0xff]  ;;  %v1043_v19 = vld [vmem:[#allocation2 + $0x28] sm:$0xff] }
  0x1a   :  { %363 = vmatpush.bf16.msra.mxu1 %v1061_v14  ;;  %v1057_v20 = vld [vmem:[#allocation7 + $0x18] sm:$0xff]  ;;  %v1056_v21 = vld [vmem:[#allocation7 + $0x10] sm:$0xff]  ;;  %v1055_v22 = vld [vmem:[#allocation7 + $0x8] sm:$0xff] }
  0x1b   :  { %v1054_v23 = vld [vmem:[#allocation7] sm:$0xff] }
  0x1c   :  { %224 = vmatpush.bf16.msra.mxu0 %v1051_v2  ;;  %1072 = vmatpush.bf16.msra.mxu3 %v1051_v2  ;;  %v1362_v25 = vld [vmem:[%s1512_s2] ss:$0 sm:$0xff] }
  0x1e   :  { %364 = vmatpush.bf16.msra.mxu1 %v1060_v15 }
  0x20   :  { %225 = vmatpush.bf16.msra.mxu0 %v1050_v3  ;;  %1073 = vmatpush.bf16.msra.mxu3 %v1050_v3  ;;  %v1069_v3 = vld [vmem:[#allocation8 + $0x38] sm:$0xff] }
  0x21   :  { %504 = vmatpush.bf16.msra.mxu2 %v1069_v3 }
  0x22   :  { %365 = vmatpush.bf16.msra.mxu1 %v1059_v16 }
  0x24   :  { %226 = vmatpush.bf16.msra.mxu0 %v1049_v4  ;;  %1074 = vmatpush.bf16.msra.mxu3 %v1049_v4 }
  0x26   :  { %366 = vmatpush.bf16.msra.mxu1 %v1058_v17 }
  0x28   :  { %227 = vmatpush.bf16.msra.mxu0 %v1048_v5  ;;  %1075 = vmatpush.bf16.msra.mxu3 %v1048_v5  ;;  %v1068_v5 = vld [vmem:[#allocation8 + $0x30] sm:$0xff] }
  0x29   :  { %505 = vmatpush.bf16.msra.mxu2 %v1068_v5 }
  0x2a   :  { %367 = vmatpush.bf16.msra.mxu1 %v1057_v20 }
  0x2c   :  { %228 = vmatpush.bf16.msra.mxu0 %v1047_v6  ;;  %1076 = vmatpush.bf16.msra.mxu3 %v1047_v6  ;;  %v1067_v6 = vld [vmem:[#allocation8 + $0x28] sm:$0xff] }
  0x2d   :  { %506 = vmatpush.bf16.msra.mxu2 %v1067_v6 }
  0x2e   :  { %368 = vmatpush.bf16.msra.mxu1 %v1056_v21 }
  0x30   :  { %229 = vmatpush.bf16.msra.mxu0 %v1046_v7  ;;  %1077 = vmatpush.bf16.msra.mxu3 %v1046_v7 }
  0x32   :  { %369 = vmatpush.bf16.msra.mxu1 %v1055_v22 }
  0x33   :  { %230 = vmatmul.bf16.vlgmr.msra.gmra.mxu0 %v1038_v8  ;;  %260 = vmatmul.bf16.vlgmr.msra.gmra.mxu3 %v1044_v9 }
  0x34   :  { %1078 = vmatpush.bf16.msrb.mxu3 %v1061_v14 }
  0x36   :  { %370 = vmatpush.bf16.msra.mxu1 %v1054_v23 }
  0x38   :  { %1079 = vmatpush.bf16.msrb.mxu3 %v1060_v15 }
  0x3c   :  { %1080 = vmatpush.bf16.msrb.mxu3 %v1059_v16 }
  0x40   :  { %1081 = vmatpush.bf16.msrb.mxu3 %v1058_v17 }
  0x43   :  { %235 = vmatmul.bf16.gmra.mxu0 %v1039_v10  ;;  %265 = vmatmul.bf16.gmra.mxu3 %v1045_v11  ;;  %v1066_v10 = vld [vmem:[#allocation8 + $0x20] sm:$0xff] }
  0x44   :  { %1082 = vmatpush.bf16.msrb.mxu3 %v1057_v20  ;;  %507 = vmatpush.bf16.msra.mxu2 %v1066_v10 }
  0x48   :  { %1083 = vmatpush.bf16.msrb.mxu3 %v1056_v21  ;;  %v1065_v21 = vld [vmem:[#allocation8 + $0x18] sm:$0xff] }
  0x49   :  { %508 = vmatpush.bf16.msra.mxu2 %v1065_v21 }
  0x4c   :  { %1084 = vmatpush.bf16.msrb.mxu3 %v1055_v22  ;;  %v1064_v22 = vld [vmem:[#allocation8 + $0x10] sm:$0xff] }
  0x4d   :  { %509 = vmatpush.bf16.msra.mxu2 %v1064_v22 }
  0x50   :  { %1085 = vmatpush.bf16.msrb.mxu3 %v1054_v23  ;;  %v1063_v23 = vld [vmem:[#allocation8 + $0x8] sm:$0xff] }
  0x51   :  { %510 = vmatpush.bf16.msra.mxu2 %v1063_v23 }
  0x53   :  { %240 = vmatmul.bf16.gmra.mxu0 %v1040_v12 }
  0x54   :  { %1086 = vmatpush.bf16.msra.mxu3 %v1069_v3 }
  0x58   :  { %1087 = vmatpush.bf16.msra.mxu3 %v1068_v5 }
  0x5c   :  { %1088 = vmatpush.bf16.msra.mxu3 %v1067_v6 }
  0x60   :  { %1089 = vmatpush.bf16.msra.mxu3 %v1066_v10 }
  0x63   :  { %245 = vmatmul.bf16.gmra.mxu0 %v1041_v13 }
  0x64   :  { %1090 = vmatpush.bf16.msra.mxu3 %v1065_v21 }
  0x68   :  { %1091 = vmatpush.bf16.msra.mxu3 %v1064_v22 }
  0x6c   :  { %1092 = vmatpush.bf16.msra.mxu3 %v1063_v23 }
  0x73   :  { %250 = vmatmul.bf16.gmra.mxu0 %v1042_v18 }
  0x83   :  { %255 = vmatmul.bf16.gmra.mxu0 %v1043_v19 }
  0xb0   :  { %v231_v24 = vpop.f32.mrf.mxu0 }
  0xb1   :  { %v232_v27 = vadd.f32 %v1362_v25, %v231_v24  ;;  %v1062_v24 = vld [vmem:[#allocation8] sm:$0xff] }
  0xb2   :  { %511 = vmatpush.bf16.msra.mxu2 %v1062_v24  ;;  %1093 = vmatpush.bf16.msra.mxu3 %v1062_v24 }
  0xb3   :  { %v271_v30 = vmax.f32 %v232_v27, 0.0 }
  0xb6   :  { %v261_v26 = vpop.f32.mrf.mxu3 }
  0xb7   :  { %v262_v32 = vadd.f32 %v1362_v25, %v261_v26 }
  0xb8   :  { %v233_v28 = vpop.f32.mrf.mxu0 }
  0xb9   :  { %v234_v29 = vadd.f32 %v1362_v25, %v233_v28  ;;  %v283_v35 = vmax.f32 %v262_v32, 0.0 }
  0xbb   :  { %v272_v31 = vmax.f32 %v234_v29, 0.0 }
  0xbd   :  { %v287_v33 = vpack.c.bf16 %v272_v31, %v271_v30 }
  0xbe   :  { %v263_v34 = vpop.f32.mrf.mxu3 }
  0xbf   :  { %371 = vmatmul.bf16.vlgmr.msra.gmra.mxu1 %v287_v33  ;;  %v264_v36 = vadd.f32 %v1362_v25, %v263_v34 }
  0xc0   :  { %v236_v37 = vpop.f32.mrf.mxu0 }
  0xc1   :  { %v284_v38 = vmax.f32 %v264_v36, 0.0  ;;  %v237_v41 = vadd.f32 %v1362_v25, %v236_v37 }
  0xc3   :  { %v293_v39 = vpack.c.bf16 %v284_v38, %v283_v35  ;;  %v273_v44 = vmax.f32 %v237_v41, 0.0 }
  0xc5   :  { %401 = vmatmul.bf16.vlgmr.msrb.gmra.mxu3 %v293_v39 }
  0xc6   :  { %v266_v40 = vpop.f32.mrf.mxu3 }
  0xc7   :  { %v267_v46 = vadd.f32 %v1362_v25, %v266_v40 }
  0xc8   :  { %v238_v42 = vpop.f32.mrf.mxu0 }
  0xc9   :  { %v239_v43 = vadd.f32 %v1362_v25, %v238_v42  ;;  %v285_v49 = vmax.f32 %v267_v46, 0.0 }
  0xcb   :  { %v274_v45 = vmax.f32 %v239_v43, 0.0 }
  0xcd   :  { %v288_v47 = vpack.c.bf16 %v274_v45, %v273_v44 }
  0xce   :  { %v268_v48 = vpop.f32.mrf.mxu3 }
  0xcf   :  { %376 = vmatmul.bf16.gmra.mxu1 %v288_v47  ;;  %v269_v50 = vadd.f32 %v1362_v25, %v268_v48 }
  0xd0   :  { %v241_v51 = vpop.f32.mrf.mxu0 }
  0xd1   :  { %v286_v52 = vmax.f32 %v269_v50, 0.0  ;;  %v242_v54 = vadd.f32 %v1362_v25, %v241_v51 }
  0xd3   :  { %v294_v53 = vpack.c.bf16 %v286_v52, %v285_v49  ;;  %v275_v57 = vmax.f32 %v242_v54, 0.0 }
  0xd5   :  { %406 = vmatmul.bf16.gmra.mxu3 %v294_v53 }
  0xd8   :  { %v243_v55 = vpop.f32.mrf.mxu0 }
  0xd9   :  { %v244_v56 = vadd.f32 %v1362_v25, %v243_v55 }
  0xdb   :  { %v276_v58 = vmax.f32 %v244_v56, 0.0 }
  0xdd   :  { %v289_v59 = vpack.c.bf16 %v276_v58, %v275_v57 }
  0xdf   :  { %381 = vmatmul.bf16.gmra.mxu1 %v289_v59 }
  0xe0   :  { %v246_v60 = vpop.f32.mrf.mxu0 }
  0xe1   :  { %v247_v61 = vadd.f32 %v1362_v25, %v246_v60 }
  0xe3   :  { %v277_v0 = vmax.f32 %v247_v61, 0.0 }
  0xe8   :  { %v248_v62 = vpop.f32.mrf.mxu0 }
  0xe9   :  { %v249_v63 = vadd.f32 %v1362_v25, %v248_v62 }
  0xeb   :  { %v278_v1 = vmax.f32 %v249_v63, 0.0 }
  0xed   :  { %v290_v2 = vpack.c.bf16 %v278_v1, %v277_v0 }
  0xef   :  { %386 = vmatmul.bf16.gmra.mxu1 %v290_v2 }
  0xf0   :  { %v251_v4 = vpop.f32.mrf.mxu0 }
  0xf1   :  { %v252_v7 = vadd.f32 %v1362_v25, %v251_v4 }
  0xf3   :  { %v279_v11 = vmax.f32 %v252_v7, 0.0 }
  0xf8   :  { %v253_v8 = vpop.f32.mrf.mxu0 }
  0xf9   :  { %v254_v9 = vadd.f32 %v1362_v25, %v253_v8 }
  0xfb   :  { %v280_v12 = vmax.f32 %v254_v9, 0.0 }
  0xfd   :  { %v291_v13 = vpack.c.bf16 %v280_v12, %v279_v11 }
  0xff   :  { %391 = vmatmul.bf16.gmra.mxu1 %v291_v13 }
 0x100   :  { %v256_v14 = vpop.f32.mrf.mxu0 }
 0x101   :  { %v257_v15 = vadd.f32 %v1362_v25, %v256_v14 }
 0x103   :  { %v281_v18 = vmax.f32 %v257_v15, 0.0 }
 0x108   :  { %v258_v16 = vpop.f32.mrf.mxu0 }
 0x109   :  { %v259_v17 = vadd.f32 %v1362_v25, %v258_v16  ;;  %v1104_v25 = vld [vmem:[%s1514_s4] ss:$0 sm:$0xff] }
 0x10b   :  { %v282_v19 = vmax.f32 %v259_v17, 0.0 }
 0x10d   :  { %v292_v20 = vpack.c.bf16 %v282_v19, %v281_v18  ;;  %v1386_v18 = vld [vmem:[%s1516_s6] ss:$0 sm:$0xff]  ;;  %s1304_s6 = smov [#allocation10]  }
 0x10e   :  { %s877_s23 = sshll.u32 %s1304_s6, 4  ;;  %s878_s23 = int_to_ptr.vmem [resolvable:$true] %s877_s23 }
 0x10f   :  { %396 = vmatmul.bf16.gmra.mxu1 %v292_v20 }
 0x13c   :  { %v372_v26 = vpop.f32.mrf.mxu1 }
 0x13d   :  { %v373_v27 = vadd.f32 %v1104_v25, %v372_v26 }
 0x13f   :  { %v412_v30 = vmax.f32 %v373_v27, 0.0 }
 0x144   :  { %v374_v28 = vpop.f32.mrf.mxu1 }
 0x145   :  { %v375_v29 = vadd.f32 %v1104_v25, %v374_v28 }
 0x147   :  { %v413_v31 = vmax.f32 %v375_v29, 0.0 }
 0x148   :  { %v402_v32 = vpop.f32.mrf.mxu3 }
 0x149   :  { %v428_v33 = vpack.c.bf16 %v413_v31, %v412_v30  ;;  %v403_v35 = vadd.f32 %v1104_v25, %v402_v32 }
 0x14b   :  { %512 = vmatmul.bf16.vlgmr.msra.gmra.mxu2 %v428_v33  ;;  %v424_v37 = vmax.f32 %v403_v35, 0.0 }
 0x14c   :  { %v377_v34 = vpop.f32.mrf.mxu1 }
 0x14d   :  { %v378_v39 = vadd.f32 %v1104_v25, %v377_v34 }
 0x14f   :  { %v414_v44 = vmax.f32 %v378_v39, 0.0 }
 0x150   :  { %v404_v36 = vpop.f32.mrf.mxu3 }
 0x151   :  { %v405_v38 = vadd.f32 %v1104_v25, %v404_v36 }
 0x153   :  { %v425_v40 = vmax.f32 %v405_v38, 0.0 }
 0x154   :  { %v379_v41 = vpop.f32.mrf.mxu1 }
 0x155   :  { %v380_v42 = vadd.f32 %v1104_v25, %v379_v41  ;;  %v434_v43 = vpack.c.bf16 %v425_v40, %v424_v37 }
 0x157   :  { %v415_v45 = vmax.f32 %v380_v42, 0.0  ;;  %542 = vmatmul.bf16.vlgmr.msra.gmra.mxu3 %v434_v43 }
 0x158   :  { %v407_v46 = vpop.f32.mrf.mxu3 }
 0x159   :  { %v429_v47 = vpack.c.bf16 %v415_v45, %v414_v44  ;;  %v408_v49 = vadd.f32 %v1104_v25, %v407_v46 }
 0x15b   :  { %517 = vmatmul.bf16.gmra.mxu2 %v429_v47  ;;  %v426_v51 = vmax.f32 %v408_v49, 0.0 }
 0x15c   :  { %v382_v48 = vpop.f32.mrf.mxu1 }
 0x15d   :  { %v383_v53 = vadd.f32 %v1104_v25, %v382_v48 }
 0x15f   :  { %v416_v58 = vmax.f32 %v383_v53, 0.0 }
 0x160   :  { %v409_v50 = vpop.f32.mrf.mxu3 }
 0x161   :  { %v410_v52 = vadd.f32 %v1104_v25, %v409_v50 }
 0x163   :  { %v427_v54 = vmax.f32 %v410_v52, 0.0 }
 0x164   :  { %v384_v55 = vpop.f32.mrf.mxu1 }
 0x165   :  { %v385_v56 = vadd.f32 %v1104_v25, %v384_v55  ;;  %v435_v57 = vpack.c.bf16 %v427_v54, %v426_v51 }
 0x167   :  { %v417_v59 = vmax.f32 %v385_v56, 0.0  ;;  %547 = vmatmul.bf16.gmra.mxu3 %v435_v57 }
 0x169   :  { %v430_v60 = vpack.c.bf16 %v417_v59, %v416_v58 }
 0x16b   :  { %522 = vmatmul.bf16.gmra.mxu2 %v430_v60 }
 0x16c   :  { %v387_v61 = vpop.f32.mrf.mxu1 }
 0x16d   :  { %v388_v62 = vadd.f32 %v1104_v25, %v387_v61 }
 0x16f   :  { %v418_v1 = vmax.f32 %v388_v62, 0.0 }
 0x174   :  { %v389_v63 = vpop.f32.mrf.mxu1 }
 0x175   :  { %v390_v0 = vadd.f32 %v1104_v25, %v389_v63 }
 0x177   :  { %v419_v2 = vmax.f32 %v390_v0, 0.0 }
 0x179   :  { %v431_v3 = vpack.c.bf16 %v419_v2, %v418_v1 }
 0x17b   :  { %527 = vmatmul.bf16.gmra.mxu2 %v431_v3 }
 0x17c   :  { %v392_v4 = vpop.f32.mrf.mxu1 }
 0x17d   :  { %v393_v5 = vadd.f32 %v1104_v25, %v392_v4 }
 0x17f   :  { %v420_v8 = vmax.f32 %v393_v5, 0.0 }
 0x184   :  { %v394_v6 = vpop.f32.mrf.mxu1 }
 0x185   :  { %v395_v7 = vadd.f32 %v1104_v25, %v394_v6 }
 0x187   :  { %v421_v9 = vmax.f32 %v395_v7, 0.0 }
 0x189   :  { %v432_v10 = vpack.c.bf16 %v421_v9, %v420_v8 }
 0x18b   :  { %532 = vmatmul.bf16.gmra.mxu2 %v432_v10 }
 0x18c   :  { %v397_v11 = vpop.f32.mrf.mxu1 }
 0x18d   :  { %v398_v12 = vadd.f32 %v1104_v25, %v397_v11 }
 0x18f   :  { %v422_v15 = vmax.f32 %v398_v12, 0.0 }
 0x194   :  { %v399_v13 = vpop.f32.mrf.mxu1 }
 0x195   :  { %v400_v14 = vadd.f32 %v1104_v25, %v399_v13 }
 0x197   :  { %v423_v16 = vmax.f32 %v400_v14, 0.0 }
 0x199   :  { %v433_v17 = vpack.c.bf16 %v423_v16, %v422_v15 }
 0x19b   :  { %537 = vmatmul.bf16.gmra.mxu2 %v433_v17 }
 0x1ce   :  { %v513_v19 = vpop.f32.mrf.mxu2 }
 0x1cf   :  { %v514_v20 = vadd.f32 %v1386_v18, %v513_v19 }
 0x1d1   :  { %v1022_v21 = vmul.f32 -1.442695, %v514_v20 }
 0x1d3   :  { %1106 = vpow2.f32 %v1022_v21 }
 0x1d6   :  { %v515_v22 = vpop.f32.mrf.mxu2 }
 0x1d7   :  { %v516_v23 = vadd.f32 %v1386_v18, %v515_v22 }
 0x1d9   :  { %v1107_v24 = vpop.eup %1106  ;;  %v1023_v26 = vmul.f32 -1.442695, %v516_v23 }
 0x1da   :  { %v601_v25 = vadd.f32 1.0, %v1107_v24  ;;  %v543_v27 = vpop.f32.mrf.mxu3 }
 0x1db   :  { %1108 = vpow2.f32 %v1023_v26  ;;  %v544_v28 = vadd.f32 %v1386_v18, %v543_v27 }
 0x1dc   :  { %1110 = vrcp.f32 %v601_v25  ;;  %v626_v42 = vand.u32 2147483647, %v601_v25  ;;  %v628_v43 = vand.u32 2147483648, %v601_v25  ;;  %vm622_vm1 = vweird.f32 %v601_v25 }
 0x1dd   :  { %v1034_v29 = vmul.f32 -1.442695, %v544_v28 }
 0x1de   :  { %v518_v30 = vpop.f32.mrf.mxu2  ;;  %v629_v52 = vor.u32 1.1754944e-38, %v628_v43  ;;  %vm627_vm3 = vcmp.eq.f32.partialorder %v626_v42, 8.507059e+37 }
 0x1df   :  { %v519_v31 = vadd.f32 %v1386_v18, %v518_v30  ;;  %1112 = vpow2.f32 %v1034_v29 }
 0x1e1   :  { %v1109_v32 = vpop.eup %1108  ;;  %v1024_v33 = vmul.f32 -1.442695, %v519_v31 }
 0x1e2   :  { %v1111_v34 = vpop.eup %1110  ;;  %v602_v35 = vadd.f32 1.0, %v1109_v32  ;;  %v545_v36 = vpop.f32.mrf.mxu3 }
 0x1e3   :  { %v618_v37 = vmul.f32 %v1111_v34, %v601_v25  ;;  %1114 = vpow2.f32 %v1024_v33  ;;  %v546_v38 = vadd.f32 %v1386_v18, %v545_v36  ;;  %vm623_vm0 = vweird.f32 %v1111_v34 }
 0x1e4   :  { %1116 = vrcp.f32 %v602_v35  ;;  %vm624_vm2 = vmor %vm622_vm1, %vm623_vm0  ;;  %v641_v58 = vand.u32 2147483647, %v602_v35  ;;  %vm637_vm4 = vweird.f32 %v602_v35  ;;  %v643_v62 = vand.u32 2147483648, %v602_v35 }
 0x1e5   :  { %v1113_v39 = vpop.eup %1112  ;;  %v619_v40 = vsub.f32 1.0, %v618_v37  ;;  %v1035_v41 = vmul.f32 -1.442695, %v546_v38 }
 0x1e6   :  { %v520_v44 = vpop.f32.mrf.mxu2  ;;  %v613_v45 = vadd.f32 1.0, %v1113_v39  ;;  %vm1400_vm6 = vcmp.eq.f32.partialorder %v641_v58, 8.507059e+37  ;;  %v644_v12 = vor.u32 1.1754944e-38, %v643_v62 }
 0x1e7   :  { %v620_v46 = vmul.f32 %v1111_v34, %v619_v40  ;;  %v521_v47 = vadd.f32 %v1386_v18, %v520_v44  ;;  %1118 = vpow2.f32 %v1035_v41 }
 0x1e8   :  { %1120 = vrcp.f32 %v613_v45  ;;  %v806_v4 = vand.u32 2147483647, %v613_v45  ;;  %v808_v6 = vand.u32 2147483648, %v613_v45  ;;  %vm802_vm7 = vweird.f32 %v613_v45 }
 0x1e9   :  { %v1115_v48 = vpop.eup %1114  ;;  %v621_v49 = vadd.f32 %v1111_v34, %v620_v46  ;;  %v1025_v50 = vmul.f32 -1.442695, %v521_v47 }
 0x1ea   :  { %v1117_v51 = vpop.eup %1116  ;;  %v1394_v53 = vadd.f32 1.0, %v1115_v48  ;;  %v548_v54 = vpop.f32.mrf.mxu3  ;;  %vm1410_vm10 = vcmp.eq.f32.partialorder %v806_v4, 8.507059e+37  ;;  %v809_v24 = vor.u32 1.1754944e-38, %v808_v6 }
 0x1eb   :  { %v625_v55 = vsel %vm624_vm2, %v1111_v34, %v621_v49  ;;  %v633_v56 = vmul.f32 %v1117_v51, %v602_v35  ;;  %1122 = vpow2.f32 %v1025_v50  ;;  %v549_v1 = vadd.f32 %v1386_v18, %v548_v54 }
 0x1ec   :  { %v630_v57 = vsel %vm627_vm3, %v629_v52, %v625_v55  ;;  %1124 = vrcp.f32 %v1394_v53  ;;  %vm638_vm5 = vweird.f32 %v1117_v51  ;;  %vm652_vm11 = vweird.f32 %v1394_v53 }
 0x1ed   :  { %v1119_v59 = vpop.eup %1118  ;;  %857 = vst [vmem:[#allocation10] sm:$0xff] %v630_v57  ;;  %v634_v60 = vsub.f32 1.0, %v633_v56  ;;  %vm639_vm9 = vmor %vm637_vm4, %vm638_vm5  ;;  %v1036_v15 = vmul.f32 -1.442695, %v549_v1  ;;  %v656_v25 = vand.u32 2147483647, %v1394_v53 }
 0x1ee   :  { %v1121_v61 = vpop.eup %1120  ;;  %v523_v63 = vpop.f32.mrf.mxu2  ;;  %v1397_v0 = vadd.f32 1.0, %v1119_v59  ;;  %v658_v29 = vand.u32 2147483648, %v1394_v53 }
 0x1ef   :  { %v635_v2 = vmul.f32 %v1117_v51, %v634_v60  ;;  %v798_v3 = vmul.f32 %v1121_v61, %v613_v45  ;;  %v524_v7 = vadd.f32 %v1386_v18, %v523_v63  ;;  %vm803_vm8 = vweird.f32 %v1121_v61 }
 0x1f0   :  { %1126 = vrcp.f32 %v1397_v0  ;;  %vm1420_vm12 = vmor %vm802_vm7, %vm803_vm8  ;;  %vm817_vm13 = vweird.f32 %v1397_v0  ;;  %v823_v36 = vand.u32 2147483648, %v1397_v0  ;;  %v821_v41 = vand.u32 2147483647, %v1397_v0 }
 0x1f1   :  { %v1123_v8 = vpop.eup %1122  ;;  %v636_v9 = vadd.f32 %v1117_v51, %v635_v2  ;;  %v799_v10 = vsub.f32 1.0, %v798_v3  ;;  %v1026_v14 = vmul.f32 -1.442695, %v524_v7  ;;  %v659_v43 = vor.u32 1.1754944e-38, %v658_v29 }
 0x1f2   :  { %v1125_v11 = vpop.eup %1124  ;;  %v1407_v13 = vadd.f32 1.0, %v1123_v8  ;;  %v550_v21 = vpop.f32.mrf.mxu3  ;;  %vm657_vm1 = vcmp.eq.f32.partialorder %v656_v25, 8.507059e+37  ;;  %vm822_vm3 = vcmp.eq.f32.partialorder %v821_v41, 8.507059e+37 }
 0x1f3   :  { %v640_v16 = vsel %vm639_vm9, %v1117_v51, %v636_v9  ;;  %v648_v17 = vmul.f32 %v1125_v11, %v1394_v53  ;;  %v800_v19 = vmul.f32 %v1121_v61, %v799_v10  ;;  %v551_v31 = vadd.f32 %v1386_v18, %v550_v21 }
 0x1f4   :  { %v645_v22 = vsel %vm1400_vm6, %v644_v12, %v640_v16  ;;  %1128 = vrcp.f32 %v1407_v13  ;;  %vm653_vm14 = vweird.f32 %v1125_v11  ;;  %v824_v53 = vor.u32 1.1754944e-38, %v823_v36 }
 0x1f5   :  { %858 = vst [vmem:[#allocation10 + $0x8] sm:$0xff] %v645_v22  ;;  %v649_v26 = vsub.f32 1.0, %v648_v17  ;;  %v801_v27 = vadd.f32 %v1121_v61, %v800_v19  ;;  %1130 = vpow2.f32 %v1026_v14  ;;  %v1037_v38 = vmul.f32 -1.442695, %v551_v31  ;;  %vm654_vm0 = vmor %vm652_vm11, %vm653_vm14 }
 0x1f6   :  { %v1127_v28 = vpop.eup %1126  ;;  %v525_v30 = vpop.f32.mrf.mxu2  ;;  %1132 = vpow2.f32 %v1036_v15  ;;  %v671_v57 = vand.u32 2147483647, %v1407_v13  ;;  %v673_v58 = vand.u32 2147483648, %v1407_v13  ;;  %vm667_vm5 = vweird.f32 %v1407_v13 }
 0x1f7   :  { %v650_v32 = vmul.f32 %v1125_v11, %v649_v26  ;;  %v805_v33 = vsel %vm1420_vm12, %v1121_v61, %v801_v27  ;;  %v813_v34 = vmul.f32 %v1127_v28, %v1397_v0  ;;  %v526_v37 = vadd.f32 %v1386_v18, %v525_v30 }
 0x1f8   :  { %v810_v35 = vsel %vm1410_vm10, %v809_v24, %v805_v33  ;;  %vm818_vm15 = vweird.f32 %v1127_v28  ;;  %1134 = vpow2.f32 %v1037_v38  ;;  %v674_v4 = vor.u32 1.1754944e-38, %v673_v58 }
 0x1f9   :  { %v651_v39 = vadd.f32 %v1125_v11, %v650_v32  ;;  %869 = vst [vmem:[#allocation10 + $0x60] sm:$0xff] %v810_v35  ;;  %v814_v40 = vsub.f32 1.0, %v813_v34  ;;  %v1027_v44 = vmul.f32 -1.442695, %v526_v37  ;;  %vm1444_vm2 = vmor %vm817_vm13, %vm818_vm15  ;;  %vm672_vm7 = vcmp.eq.f32.partialorder %v671_v57, 8.507059e+37 }
 0x1fa   :  { %v1129_v42 = vpop.eup %1128 }
 0x1fb   :  { %v1131_v45 = vpop.eup %1130  ;;  %v655_v46 = vsel %vm654_vm0, %v1125_v11, %v651_v39  ;;  %v663_v47 = vmul.f32 %v1129_v42, %v1407_v13  ;;  %v815_v48 = vmul.f32 %v1127_v28, %v814_v40  ;;  %1136 = vpow2.f32 %v1027_v44 }
 0x1fc   :  { %v1133_v49 = vpop.eup %1132  ;;  %v660_v50 = vsel %vm657_vm1, %v659_v43, %v655_v46  ;;  %v1439_v51 = vadd.f32 1.0, %v1131_v45  ;;  %vm668_vm4 = vweird.f32 %v1129_v42 }
 0x1fd   :  { %859 = vst [vmem:[#allocation10 + $0x10] sm:$0xff] %v660_v50  ;;  %v664_v54 = vsub.f32 1.0, %v663_v47  ;;  %v816_v55 = vadd.f32 %v1127_v28, %v815_v48  ;;  %v615_v56 = vadd.f32 1.0, %v1133_v49  ;;  %vm669_vm6 = vmor %vm667_vm5, %vm668_vm4 }
 0x1fe   :  { %1138 = vrcp.f32 %v1439_v51  ;;  %v528_v59 = vpop.f32.mrf.mxu2  ;;  %v1135_v62 = vpop.eup %1134  ;;  %v686_v12 = vand.u32 2147483647, %v1439_v51  ;;  %v688_v13 = vand.u32 2147483648, %v1439_v51  ;;  %vm682_vm8 = vweird.f32 %v1439_v51 }
 0x1ff   :  { %v665_v60 = vmul.f32 %v1129_v42, %v664_v54  ;;  %v820_v61 = vsel %vm1444_vm2, %v1127_v28, %v816_v55  ;;  %1140 = vrcp.f32 %v615_v56  ;;  %v529_v1 = vadd.f32 %v1386_v18, %v528_v59 }
 0x200   :  { %v825_v63 = vsel %vm822_vm3, %v824_v53, %v820_v61  ;;  %v1455_v2 = vadd.f32 1.0, %v1135_v62  ;;  %v836_v15 = vand.u32 2147483647, %v615_v56  ;;  %v838_v16 = vand.u32 2147483648, %v615_v56 }
 0x201   :  { %v666_v0 = vadd.f32 %v1129_v42, %v665_v60  ;;  %870 = vst [vmem:[#allocation10 + $0x68] sm:$0xff] %v825_v63  ;;  %v1137_v3 = vpop.eup %1136  ;;  %v1028_v7 = vmul.f32 -1.442695, %v529_v1  ;;  %vm832_vm9 = vweird.f32 %v615_v56  ;;  %vm1466_vm12 = vcmp.eq.f32.partialorder %v686_v12, 8.507059e+37 }
 0x202   :  { %v1457_v6 = vadd.f32 1.0, %v1137_v3  ;;  %1142 = vrcp.f32 %v1455_v2  ;;  %v689_v24 = vor.u32 1.1754944e-38, %v688_v13  ;;  %vm1470_vm13 = vcmp.eq.f32.partialorder %v836_v15, 8.507059e+37 }
 0x203   :  { %v670_v5 = vsel %vm669_vm6, %v1129_v42, %v666_v0  ;;  %v839_v28 = vor.u32 1.1754944e-38, %v838_v16  ;;  %vm847_vm15 = vweird.f32 %v1455_v2  ;;  %v851_v34 = vand.u32 2147483647, %v1455_v2 }
 0x204   :  { %v1139_v8 = vpop.eup %1138  ;;  %v675_v9 = vsel %vm672_vm7, %v674_v4, %v670_v5  ;;  %1144 = vrcp.f32 %v1457_v6  ;;  %v853_v37 = vand.u32 2147483648, %v1455_v2  ;;  %v701_v40 = vand.u32 2147483647, %v1457_v6 }
 0x205   :  { %v1141_v10 = vpop.eup %1140  ;;  %860 = vst [vmem:[#allocation10 + $0x18] sm:$0xff] %v675_v9  ;;  %v678_v11 = vmul.f32 %v1139_v8, %v1439_v51  ;;  %1146 = vpow2.f32 %v1028_v7  ;;  %vm683_vm11 = vweird.f32 %v1139_v8  ;;  %v703_v47 = vand.u32 2147483648, %v1457_v6 }
 0x206   :  { %v828_v14 = vmul.f32 %v1141_v10, %v615_v56  ;;  %v530_v17 = vpop.f32.mrf.mxu2  ;;  %vm833_vm10 = vweird.f32 %v1141_v10  ;;  %vm684_vm0 = vmor %vm682_vm8, %vm683_vm11  ;;  %v854_v53 = vor.u32 1.1754944e-38, %v853_v37  ;;  %vm852_vm4 = vcmp.eq.f32.partialorder %v851_v34, 8.507059e+37 }
 0x207   :  { %v679_v19 = vsub.f32 1.0, %v678_v11  ;;  %v531_v21 = vadd.f32 %v1386_v18, %v530_v17  ;;  %vm1474_vm14 = vmor %vm832_vm9, %vm833_vm10  ;;  %vm697_vm5 = vweird.f32 %v1457_v6  ;;  %v704_v58 = vor.u32 1.1754944e-38, %v703_v47 }
 0x208   :  { %v829_v20 = vsub.f32 1.0, %v828_v14  ;;  %v1143_v26 = vpop.eup %1142  ;;  %vm702_vm7 = vcmp.eq.f32.partialorder %v701_v40, 8.507059e+37 }
 0x209   :  { %v680_v22 = vmul.f32 %v1139_v8, %v679_v19  ;;  %v1029_v29 = vmul.f32 -1.442695, %v531_v21  ;;  %v843_v33 = vmul.f32 %v1143_v26, %v1455_v2  ;;  %vm848_vm1 = vweird.f32 %v1143_v26 }
 0x20a   :  { %v830_v25 = vmul.f32 %v1141_v10, %v829_v20  ;;  %v1145_v30 = vpop.eup %1144  ;;  %vm1497_vm3 = vmor %vm847_vm15, %vm848_vm1 }
 0x20b   :  { %v681_v31 = vadd.f32 %v1139_v8, %v680_v22  ;;  %v693_v35 = vmul.f32 %v1145_v30, %v1457_v6  ;;  %1148 = vpow2.f32 %v1029_v29  ;;  %v1147_v38 = vpop.eup %1146  ;;  %v844_v41 = vsub.f32 1.0, %v843_v33 }
 0x20c   :  { %v831_v36 = vadd.f32 %v1141_v10, %v830_v25  ;;  %v607_v45 = vadd.f32 1.0, %v1147_v38  ;;  %vm698_vm2 = vweird.f32 %v1145_v30 }
 0x20d   :  { %v685_v39 = vsel %vm684_vm0, %v1139_v8, %v681_v31  ;;  %v694_v43 = vsub.f32 1.0, %v693_v35  ;;  %v845_v49 = vmul.f32 %v1143_v26, %v844_v41  ;;  %vm699_vm6 = vmor %vm697_vm5, %vm698_vm2 }
 0x20e   :  { %v690_v42 = vsel %vm1466_vm12, %v689_v24, %v685_v39  ;;  %v835_v44 = vsel %vm1474_vm14, %v1141_v10, %v831_v36  ;;  %v533_v46 = vpop.f32.mrf.mxu2  ;;  %1150 = vrcp.f32 %v607_v45  ;;  %v718_v7 = vand.u32 2147483648, %v607_v45 }
 0x20f   :  { %861 = vst [vmem:[#allocation10 + $0x20] sm:$0xff] %v690_v42  ;;  %v840_v48 = vsel %vm1470_vm13, %v839_v28, %v835_v44  ;;  %v534_v50 = vadd.f32 %v1386_v18, %v533_v46  ;;  %v695_v51 = vmul.f32 %v1145_v30, %v694_v43  ;;  %v846_v54 = vadd.f32 %v1143_v26, %v845_v49 }
 0x210   :  { %871 = vst [vmem:[#allocation10 + $0x70] sm:$0xff] %v840_v48  ;;  %v716_v11 = vand.u32 2147483647, %v607_v45  ;;  %vm712_vm9 = vweird.f32 %v607_v45  ;;  %v719_v14 = vor.u32 1.1754944e-38, %v718_v7 }
 0x211   :  { %v1030_v55 = vmul.f32 -1.442695, %v534_v50  ;;  %v1149_v56 = vpop.eup %1148  ;;  %v696_v57 = vadd.f32 %v1145_v30, %v695_v51  ;;  %v850_v59 = vsel %vm1497_vm3, %v1143_v26, %v846_v54 }
 0x212   :  { %v608_v60 = vadd.f32 1.0, %v1149_v56  ;;  %v855_v62 = vsel %vm852_vm4, %v854_v53, %v850_v59  ;;  %vm717_vm11 = vcmp.eq.f32.partialorder %v716_v11, 8.507059e+37 }
 0x213   :  { %1152 = vpow2.f32 %v1030_v55  ;;  %v700_v61 = vsel %vm699_vm6, %v1145_v30, %v696_v57  ;;  %872 = vst [vmem:[#allocation10 + $0x78] sm:$0xff] %v855_v62 }
 0x214   :  { %v705_v63 = vsel %vm702_vm7, %v704_v58, %v700_v61  ;;  %1154 = vrcp.f32 %v608_v60  ;;  %v1151_v0 = vpop.eup %1150  ;;  %v733_v19 = vand.u32 2147483648, %v608_v60  ;;  %v731_v23 = vand.u32 2147483647, %v608_v60 }
 0x215   :  { %862 = vst [vmem:[#allocation10 + $0x28] sm:$0xff] %v705_v63  ;;  %v708_v2 = vmul.f32 %v1151_v0, %v607_v45  ;;  %vm713_vm8 = vweird.f32 %v1151_v0  ;;  %vm727_vm13 = vweird.f32 %v608_v60 }
 0x216   :  { %v535_v1 = vpop.f32.mrf.mxu2  ;;  %vm714_vm10 = vmor %vm712_vm9, %vm713_vm8  ;;  %v734_v29 = vor.u32 1.1754944e-38, %v733_v19  ;;  %vm732_vm15 = vcmp.eq.f32.partialorder %v731_v23, 8.507059e+37 }
 0x217   :  { %v536_v3 = vadd.f32 %v1386_v18, %v535_v1  ;;  %v709_v5 = vsub.f32 1.0, %v708_v2 }
 0x219   :  { %v1153_v4 = vpop.eup %1152  ;;  %v1031_v6 = vmul.f32 -1.442695, %v536_v3  ;;  %v710_v10 = vmul.f32 %v1151_v0, %v709_v5 }
 0x21a   :  { %v609_v8 = vadd.f32 1.0, %v1153_v4  ;;  %v1155_v9 = vpop.eup %1154 }
 0x21b   :  { %1156 = vpow2.f32 %v1031_v6  ;;  %v723_v12 = vmul.f32 %v1155_v9, %v608_v60  ;;  %v711_v13 = vadd.f32 %v1151_v0, %v710_v10  ;;  %vm728_vm12 = vweird.f32 %v1155_v9 }
 0x21c   :  { %1158 = vrcp.f32 %v609_v8  ;;  %vm729_vm14 = vmor %vm727_vm13, %vm728_vm12  ;;  %v748_v34 = vand.u32 2147483648, %v609_v8  ;;  %v746_v37 = vand.u32 2147483647, %v609_v8  ;;  %vm742_vm1 = vweird.f32 %v609_v8 }
 0x21d   :  { %v724_v15 = vsub.f32 1.0, %v723_v12  ;;  %v715_v17 = vsel %vm714_vm10, %v1151_v0, %v711_v13 }
 0x21e   :  { %v538_v16 = vpop.f32.mrf.mxu2  ;;  %v720_v21 = vsel %vm717_vm11, %v719_v14, %v715_v17  ;;  %v749_v43 = vor.u32 1.1754944e-38, %v748_v34  ;;  %vm747_vm3 = vcmp.eq.f32.partialorder %v746_v37, 8.507059e+37 }
 0x21f   :  { %v539_v20 = vadd.f32 %v1386_v18, %v538_v16  ;;  %v725_v22 = vmul.f32 %v1155_v9, %v724_v15  ;;  %863 = vst [vmem:[#allocation10 + $0x30] sm:$0xff] %v720_v21 }
 0x221   :  { %v1157_v24 = vpop.eup %1156  ;;  %v1032_v26 = vmul.f32 -1.442695, %v539_v20  ;;  %v726_v27 = vadd.f32 %v1155_v9, %v725_v22 }
 0x222   :  { %v1159_v25 = vpop.eup %1158  ;;  %v610_v28 = vadd.f32 1.0, %v1157_v24 }
 0x223   :  { %v738_v30 = vmul.f32 %v1159_v25, %v609_v8  ;;  %1160 = vpow2.f32 %v1032_v26  ;;  %v730_v31 = vsel %vm729_vm14, %v1155_v9, %v726_v27  ;;  %vm743_vm0 = vweird.f32 %v1159_v25 }
 0x224   :  { %1162 = vrcp.f32 %v610_v28  ;;  %v735_v32 = vsel %vm732_vm15, %v734_v29, %v730_v31  ;;  %vm744_vm2 = vmor %vm742_vm1, %vm743_vm0  ;;  %v763_v49 = vand.u32 2147483648, %v610_v28  ;;  %vm757_vm5 = vweird.f32 %v610_v28 }
 0x225   :  { %v739_v33 = vsub.f32 1.0, %v738_v30  ;;  %864 = vst [vmem:[#allocation10 + $0x38] sm:$0xff] %v735_v32 }
 0x226   :  { %v540_v35 = vpop.f32.mrf.mxu2  ;;  %v764_v54 = vor.u32 1.1754944e-38, %v763_v49 }
 0x227   :  { %v740_v36 = vmul.f32 %v1159_v25, %v739_v33  ;;  %v541_v38 = vadd.f32 %v1386_v18, %v540_v35  ;;  %v761_v18 = vand.u32 2147483647, %v610_v28 }
 0x229   :  { %v1161_v39 = vpop.eup %1160  ;;  %v741_v40 = vadd.f32 %v1159_v25, %v740_v36  ;;  %v1033_v41 = vmul.f32 -1.442695, %v541_v38  ;;  %vm762_vm7 = vcmp.eq.f32.partialorder %v761_v18, 8.507059e+37 }
 0x22a   :  { %v1163_v42 = vpop.eup %1162  ;;  %v611_v44 = vadd.f32 1.0, %v1161_v39 }
 0x22b   :  { %v745_v45 = vsel %vm744_vm2, %v1159_v25, %v741_v40  ;;  %v753_v46 = vmul.f32 %v1163_v42, %v610_v28  ;;  %1164 = vpow2.f32 %v1033_v41  ;;  %vm758_vm4 = vweird.f32 %v1163_v42 }
 0x22c   :  { %v750_v47 = vsel %vm747_vm3, %v749_v43, %v745_v45  ;;  %1166 = vrcp.f32 %v611_v44  ;;  %vm759_vm6 = vmor %vm757_vm5, %vm758_vm4  ;;  %v778_v60 = vand.u32 2147483648, %v611_v44  ;;  %v776_v62 = vand.u32 2147483647, %v611_v44 }
 0x22d   :  { %865 = vst [vmem:[#allocation10 + $0x40] sm:$0xff] %v750_v47  ;;  %v754_v48 = vsub.f32 1.0, %v753_v46  ;;  %vm772_vm9 = vweird.f32 %v611_v44 }
 0x22e   :  { %v779_v1 = vor.u32 1.1754944e-38, %v778_v60  ;;  %vm777_vm11 = vcmp.eq.f32.partialorder %v776_v62, 8.507059e+37 }
 0x22f   :  { %v755_v50 = vmul.f32 %v1163_v42, %v754_v48 }
 0x231   :  { %v1165_v51 = vpop.eup %1164  ;;  %v756_v52 = vadd.f32 %v1163_v42, %v755_v50 }
 0x232   :  { %v1167_v53 = vpop.eup %1166  ;;  %v612_v55 = vadd.f32 1.0, %v1165_v51 }
 0x233   :  { %v760_v56 = vsel %vm759_vm6, %v1163_v42, %v756_v52  ;;  %v768_v57 = vmul.f32 %v1167_v53, %v611_v44  ;;  %vm773_vm8 = vweird.f32 %v1167_v53 }
 0x234   :  { %v765_v58 = vsel %vm762_vm7, %v764_v54, %v760_v56  ;;  %1168 = vrcp.f32 %v612_v55  ;;  %vm774_vm10 = vmor %vm772_vm9, %vm773_vm8  ;;  %v793_v6 = vand.u32 2147483648, %v612_v55  ;;  %v791_v8 = vand.u32 2147483647, %v612_v55 }
 0x235   :  { %866 = vst [vmem:[#allocation10 + $0x48] sm:$0xff] %v765_v58  ;;  %v769_v59 = vsub.f32 1.0, %v768_v57  ;;  %vm787_vm13 = vweird.f32 %v612_v55 }
 0x236   :  { %v794_v10 = vor.u32 1.1754944e-38, %v793_v6  ;;  %vm792_vm15 = vcmp.eq.f32.partialorder %v791_v8, 8.507059e+37 }
 0x237   :  { %v770_v61 = vmul.f32 %v1167_v53, %v769_v59 }
 0x239   :  { %v771_v63 = vadd.f32 %v1167_v53, %v770_v61 }
 0x23a   :  { %v1169_v0 = vpop.eup %1168 }
 0x23b   :  { %v775_v2 = vsel %vm774_vm10, %v1167_v53, %v771_v63  ;;  %v783_v3 = vmul.f32 %v1169_v0, %v612_v55  ;;  %vm788_vm12 = vweird.f32 %v1169_v0 }
 0x23c   :  { %v780_v4 = vsel %vm777_vm11, %v779_v1, %v775_v2  ;;  %vm789_vm14 = vmor %vm787_vm13, %vm788_vm12 }
 0x23d   :  { %867 = vst [vmem:[#allocation10 + $0x50] sm:$0xff] %v780_v4  ;;  %v784_v5 = vsub.f32 1.0, %v783_v3 }
 0x23f   :  { %v785_v7 = vmul.f32 %v1169_v0, %v784_v5 }
 0x241   :  { %v786_v9 = vadd.f32 %v1169_v0, %v785_v7 }
 0x243   :  { %v790_v11 = vsel %vm789_vm14, %v1169_v0, %v786_v9 }
 0x244   :  { %v795_v12 = vsel %vm792_vm15, %v794_v10, %v790_v11 }
 0x245   :  { %868 = vst [vmem:[#allocation10 + $0x58] sm:$0xff] %v795_v12 }
 0x246   :  { %885 = dma.vmem_to_hbm [thread:$0]  %s878_s23, 2048, %s880_s26, [#allocation4], %s1305_s27, %s1305_s27, %s1306_s28  }
 0x247   :  { %1296 = dma.done.wait [#allocation4], 2048  }
 0x248   :  { %1297 = vsyncadd [#allocation4], 4294965248 }
 0x249   :  { %890 = vsyncpa [#allocation3], 1 }
 0x24a   :  { %891 = vsyncpa [#allocation6], 1 }
 0x24b   :  { %892 = vsyncpa [#allocation9], 1 }
 0x24c   :  { %893 = vsyncpa [#allocation4], 1 }

</bundles_post_ra>
